<compile_context>
chip_gen: v5e
topology: v5e:2x2
jax: 0.10.0
libtpu: 0.0.40
codegen_flags: <defaults>
</compile_context>

<pallas_src>
import math

import jax
import jax.numpy as jnp
from jax.experimental import pallas as pl
from jax.experimental.pallas import tpu as pltpu


def _pick_row_tile(n_rows, bytes_per_row, cap_bytes=4 << 20):
    """Largest multiple-of-8 divisor of n_rows whose tile fits cap_bytes.

    Falls back to n_rows (full-extent block, always layout-legal) when no such
    divisor exists; avoids any host-side padding pass. The ~4 MiB cap keeps the
    double-buffered pipeline well under the default scoped VMEM limit on
    v5e/v6e/v7x while amortizing the ~0.35 us per-grid-step overhead.
    """
    max_rows = max(8, cap_bytes // max(int(bytes_per_row), 1))
    best = 0
    d = 8
    limit = min(n_rows, max_rows)
    while d <= limit:
        if n_rows % d == 0:
            best = d
        d += 8
    return best if best else n_rows


# ---------------------------------------------------------------------------
# Pallas kernels
# ---------------------------------------------------------------------------
def _linear_sinepos_kernel(x_ref, wt_ref, pe_ref, o_ref):
    # x_ref : (TM, Cin)  x.dtype -- cast to bf16 in-kernel for the MXU
    # wt_ref: (Cin, D)   bf16    -- transposed Linear weight, block index fixed
    # pe_ref: (TM, D)    f32     -- sine table with Linear bias pre-folded
    # o_ref : (TM, D)    x.dtype
    y = jnp.dot(x_ref[...].astype(jnp.bfloat16), wt_ref[...],
                preferred_element_type=jnp.float32)          # MXU, f32 accumulate
    o_ref[...] = (y + pe_ref[...]).astype(o_ref.dtype)       # f32 epilogue


def _add_sinepos_kernel(x_ref, pe_ref, o_ref):
    # x_ref : (B, TL, D) -- full batch in-block (pe broadcasts over batch)
    # pe_ref: (TL, D)    f32
    # o_ref : (B, TL, D) x.dtype
    o_ref[...] = (x_ref[...].astype(jnp.float32) + pe_ref[...]).astype(o_ref.dtype)


# ---------------------------------------------------------------------------
# pallas_call wrappers
# ---------------------------------------------------------------------------
def linear_sinepos(x, wt_bf16, pe_biased):
    """y[b, l] = x[b, l] @ W.T + bias + pe[l]   (bias pre-folded into pe)."""
    B, L, Cin = x.shape
    D = wt_bf16.shape[1]
    # Per-step tile bytes ~ TM*(Cin + 2*D)*4.
    TM = _pick_row_tile(L, 4 * (Cin + 2 * D))

    return pl.pallas_call(
        _linear_sinepos_kernel,
        out_shape=jax.ShapeDtypeStruct((B, L, D), x.dtype),
        grid=(L // TM, B),                                   # batch innermost
        in_specs=[
            pl.BlockSpec((None, TM, Cin), lambda l, b: (b, l, 0)),
            pl.BlockSpec((Cin, D), lambda l, b: (0, 0)),     # resident weight
            pl.BlockSpec((TM, D), lambda l, b: (l, 0)),      # PE reused across b
        ],
        out_specs=pl.BlockSpec((None, TM, D), lambda l, b: (b, l, 0)),
        compiler_params=pltpu.CompilerParams(
            dimension_semantics=("parallel", "parallel")),
    )(x, wt_bf16, pe_biased)


def add_sinepos(x, pe):
    """y = x + pe (Identity linear path), streamed as (B, TL, D) tiles."""
    B, L, D = x.shape
    # Per-step tile bytes ~ TL*D*4*(2B + 1)  (x in, out, pe).
    TL = _pick_row_tile(L, 4 * D * (2 * B + 1))

    return pl.pallas_call(
        _add_sinepos_kernel,
        out_shape=jax.ShapeDtypeStruct((B, L, D), x.dtype),
        grid=(L // TL,),
        in_specs=[
            pl.BlockSpec((B, TL, D), lambda l: (0, l, 0)),
            pl.BlockSpec((TL, D), lambda l: (l, 0)),
        ],
        out_specs=pl.BlockSpec((B, TL, D), lambda l: (0, l, 0)),
        compiler_params=pltpu.CompilerParams(dimension_semantics=("parallel",)),
    )(x, pe)


# ---------------------------------------------------------------------------
# Parameter / buffer construction (deterministic, in-script)
# ---------------------------------------------------------------------------
def build_sine_pe(max_len, d_model, dtype=jnp.float32):
    # pe[p, 2i]   = sin(p / 10000^(2i/d_model))
    # pe[p, 2i+1] = cos(p / 10000^(2i/d_model))
    pos = jnp.arange(max_len, dtype=jnp.float32)[:, None]
    idx = jnp.arange(0, d_model, 2, dtype=jnp.float32)[None, :]
    div = jnp.exp(-math.log(10000.0) * idx / d_model)
    ang = pos * div
    pe = jnp.zeros((max_len, d_model), jnp.float32)
    pe = pe.at[:, 0::2].set(jnp.sin(ang))
    pe = pe.at[:, 1::2].set(jnp.cos(ang))
    return pe.astype(dtype)


class PallasSinePosModel:
    """JAX/Pallas port of models/metaformer/emb/sine_pos.Model."""

    def __init__(self, in_dim, d_model, max_len, num_embed_tokens=None, *, key):
        self.in_dim = in_dim
        self.d_model = d_model
        self.num_embed_tokens = num_embed_tokens
        k_w, k_b, k_e = jax.random.split(key, 3)

        self.pe = build_sine_pe(max_len, d_model)            # (max_len, d_model) f32

        if in_dim != d_model:
            # nn.Linear default init: U(-1/sqrt(in_dim), 1/sqrt(in_dim))
            bound = 1.0 / math.sqrt(in_dim)
            self.w = jax.random.uniform(k_w, (d_model, in_dim), jnp.float32,
                                        -bound, bound)
            self.b = jax.random.uniform(k_b, (d_model,), jnp.float32, -bound, bound)
            # Hoisted once: transpose + bf16 cast for the MXU (~1e-2 rel error
            # vs the f32 PyTorch Linear; kernel is HBM-bound either way).
            self.wt_bf16 = self.w.T.astype(jnp.bfloat16)      # (in_dim, d_model)
            # Fold the Linear bias into the positional table once.
            self.pe_biased = self.pe + self.b[None, :]        # (max_len, d_model) f32
        else:
            self.w = self.b = None                            # nn.Identity
            self.wt_bf16 = None
            self.pe_biased = None

        if num_embed_tokens:
            # embed_tokens.weight.data.normal_(mean=0, std=0.7)
            self.embed_tokens = 0.7 * jax.random.normal(
                k_e, (num_embed_tokens, d_model), jnp.float32)
        else:
            self.embed_tokens = None

    def __call__(self, x, mask):
        B, L, _ = x.shape
        if self.embed_tokens is not None:
            # Glue in plain JAX (concat/truncate, not kernel work). Slice before
            # concat so rows the [:, :L] truncate would discard are never written.
            T = min(self.num_embed_tokens, L)
            keep = L - T
            ones = jnp.ones((B, T), dtype=jnp.bool_)
            mask = jnp.concatenate([ones, mask[:, :keep].astype(jnp.bool_)], axis=1)
            emb = jnp.broadcast_to(self.embed_tokens[None, :T],
                                   (B, T, self.d_model)).astype(x.dtype)
            x = jnp.concatenate([emb, x[:, :keep, :]], axis=1)

        # TODO(synk): assumes L <= max_len (same implicit assumption as the
        # PyTorch reference's pe[:, :L] indexing).
        if self.wt_bf16 is not None:
            x = linear_sinepos(x, self.wt_bf16, self.pe_biased[:L])
        else:
            x = add_sinepos(x, self.pe[:L])
        return x, mask


# ---------------------------------------------------------------------------
if __name__ == "__main__":
    key = jax.random.PRNGKey(0)
    k_model_a, k_model_b, k_x, k_m, k_x2 = jax.random.split(key, 5)

    B, L = 2, 8

    # Config A: in_dim != d_model -> fused Linear (bf16 MXU) + sine pos-emb
    in_dim, d_model = 16, 32
    model_a = PallasSinePosModel(in_dim, d_model, max_len=64,
                                 num_embed_tokens=None, key=k_model_a)
    x = jax.random.normal(k_x, (B, L, in_dim), jnp.float32)
    mask = jax.random.uniform(k_m, (B, L)) > 0.5
    out_a, mask_a = model_a(x, mask)
    jax.block_until_ready(out_a)
    assert out_a.shape == (B, L, d_model) and mask_a.shape == (B, L)
    assert bool(jnp.all(jnp.isfinite(out_a)))
    ref_a = jnp.einsum("bli,di->bld", x, model_a.w) + model_a.b + model_a.pe[:L][None]
    assert bool(jnp.allclose(out_a, ref_a, atol=5e-2, rtol=5e-2))  # bf16 matmul tol

    # Config B: in_dim == d_model with prepended embed tokens (Identity + pos-emb)
    model_b = PallasSinePosModel(d_model, d_model, max_len=64,
                                 num_embed_tokens=4, key=k_model_b)
    x2 = jax.random.normal(k_x2, (B, L, d_model), jnp.float32)
    out_b, mask_b = model_b(x2, mask)
    jax.block_until_ready(out_b)
    assert out_b.shape == (B, L, d_model) and mask_b.shape == (B, L)
    assert bool(jnp.all(jnp.isfinite(out_b)))
    T = 4
    x2_glued = jnp.concatenate(
        [jnp.broadcast_to(model_b.embed_tokens[None], (B, T, d_model)),
         x2[:, :L - T, :]], axis=1)
    ref_b = x2_glued + model_b.pe[:L][None]
    assert bool(jnp.allclose(out_b, ref_b, atol=1e-5, rtol=1e-5))
    mask_ref_b = jnp.concatenate(
        [jnp.ones((B, T), jnp.bool_), mask[:, :L - T]], axis=1)
    assert bool(jnp.all(mask_b == mask_ref_b))

    print("KERNEL_OK")
</pallas_src>

<mosaic_0001>
module attributes {stable_mosaic.version = 11 : i64} {
  func.func @_linear_sinepos_kernel(%arg0: i32, %arg1: i32, %arg2: memref<1x8x16xf32, #tpu.memory_space<vmem>>, %arg3: memref<16x32xbf16, #tpu.memory_space<vmem>>, %arg4: memref<8x32xf32, #tpu.memory_space<vmem>>, %arg5: memref<1x8x32xf32, #tpu.memory_space<vmem>>) attributes {dimension_semantics = [#tpu.dimension_semantics<parallel>, #tpu.dimension_semantics<parallel>], iteration_bounds = array<i64: 1, 2>, scalar_prefetch = 0 : i64, scratch_operands = 0 : i64, tpu.core_type = #tpu.core_type<tc>, window_params = [{transform_indices = @transform_0, window_bounds = array<i64: 1, 8, 16>}, {pipeline_mode = #tpu.pipeline_mode<synchronous>, transform_indices = @transform_1, window_bounds = array<i64: 16, 32>}, {transform_indices = @transform_2, window_bounds = array<i64: 8, 32>}, {transform_indices = @transform_3, window_bounds = array<i64: 1, 8, 32>}]} {
    %c0 = arith.constant 0 : index
    %c0_0 = arith.constant 0 : index
    %c0_1 = arith.constant 0 : index
    %0 = vector.load %arg2[%c0, %c0_0, %c0_1] : memref<1x8x16xf32, #tpu.memory_space<vmem>>, vector<1x8x16xf32>
    %1 = vector.shape_cast %0 : vector<1x8x16xf32> to vector<8x16xf32>
    %2 = arith.truncf %1 : vector<8x16xf32> to vector<8x16xbf16>
    %c0_2 = arith.constant 0 : index
    %c0_3 = arith.constant 0 : index
    %3 = vector.load %arg3[%c0_2, %c0_3] : memref<16x32xbf16, #tpu.memory_space<vmem>>, vector<16x32xbf16>
    %cst = arith.constant dense<0.000000e+00> : vector<8x32xf32>
    %4 = tpu.matmul %2, %3, %cst {dimension_numbers = #tpu.dot_dimension_numbers<[1], [0], [0], [1], [0, 0, 1, 1], [], []>} : vector<8x16xbf16>, vector<16x32xbf16>, vector<8x32xf32> -> vector<8x32xf32>
    %c0_4 = arith.constant 0 : index
    %c0_5 = arith.constant 0 : index
    %5 = vector.load %arg4[%c0_4, %c0_5] : memref<8x32xf32, #tpu.memory_space<vmem>>, vector<8x32xf32>
    %6 = arith.addf %4, %5 : vector<8x32xf32>
    %c0_6 = arith.constant 0 : index
    %c0_7 = arith.constant 0 : index
    %c0_8 = arith.constant 0 : index
    %7 = vector.load %arg5[%c0_6, %c0_7, %c0_8] : memref<1x8x32xf32, #tpu.memory_space<vmem>>, vector<1x8x32xf32>
    %8 = vector.shape_cast %7 : vector<1x8x32xf32> to vector<8x32xf32>
    %9 = vector.shape_cast %6 : vector<8x32xf32> to vector<1x8x32xf32>
    tpu.vector_store %arg5[%c0_6, %c0_7, %c0_8], %9 {strides = array<i32>} : memref<1x8x32xf32, #tpu.memory_space<vmem>>, vector<1x8x32xf32>,
    return
  }
  func.func @transform_0(%arg0: i32, %arg1: i32) -> (i32, i32, i32) {
    %c0_i32 = arith.constant 0 : i32
    %c0_i32_0 = arith.constant 0 : i32
    return %arg1, %arg0, %c0_i32 : i32, i32, i32
  }
  func.func @transform_1(%arg0: i32, %arg1: i32) -> (i32, i32) {
    %c0_i32 = arith.constant 0 : i32
    %c0_i32_0 = arith.constant 0 : i32
    %c0_i32_1 = arith.constant 0 : i32
    return %c0_i32, %c0_i32_0 : i32, i32
  }
  func.func @transform_2(%arg0: i32, %arg1: i32) -> (i32, i32) {
    %c0_i32 = arith.constant 0 : i32
    %c0_i32_0 = arith.constant 0 : i32
    return %arg0, %c0_i32 : i32, i32
  }
  func.func @transform_3(%arg0: i32, %arg1: i32) -> (i32, i32, i32) {
    %c0_i32 = arith.constant 0 : i32
    %c0_i32_0 = arith.constant 0 : i32
    return %arg1, %arg0, %c0_i32 : i32, i32, i32
  }
}

</mosaic_0001>

<bundles_post_ra>
// kernel: tpu_custom_call.1
= control target key start
LH: loop header
LB: loop body
LE: loop exit
PB: predicated region body
PF: predicated region fallthrough
CT: control target
= control target key end

     0   :  { %8 = vsyncpa [#allocation3], 0  ;;  %s846_s0 = inlined_call_operand.hbm [shape: f32[2,8,16], index: 0, kind: input, shape index: {}]   ;;  %s847_s1 = inlined_call_operand.hbm [shape: bf16[16,32], index: 1, kind: input, shape index: {}]   ;;  %s848_s2 = inlined_call_operand.hbm [shape: f32[8,32], index: 2, kind: input, shape index: {}]   ;;  %s849_s3 = inlined_call_operand.hbm [shape: f32[2,8,32], index: 3, kind: output, shape index: {}]  }
   0x1   :  { %10 = vsyncpa [#allocation3 + $0x1], 0 }
   0x2   :  { %11 = vsyncpa [#allocation6], 0 }
   0x3   :  { %12 = vsyncpa [#allocation4], 0 }
   0x4   :  { %14 = vsyncpa [#allocation4 + $0x1], 0  ;;  %s702_s12 = smov 0   ;;  %s704_s13 = smov 0  }
   0x5   :  { %s706_s14 = smov 0   ;;  %s708_s15 = smov 0  }
   0x6   :  { %s710_s16 = smov 0   ;;  %s712_s17 = smov 0  }
   0x7 LB: > { %s392_s18 = sadd.s32 4294967295, %s676_s17   ;;  %p394_p0 = scmp.ge.s32.totalorder %s676_s17, 1  ;;  %s676_s17 = sphi %s712_s17, %s20_s17   ;;  %s672_s16 = sphi %s710_s16, %s859_s16   ;;  %s668_s15 = sphi %s708_s15, %s858_s15   ;;  %s664_s14 = sphi %s706_s14, %s857_s14   ;;  %s660_s13 = sphi %s704_s13, %s856_s13   ;;  %s656_s12 = sphi %s702_s12, %s855_s12  }
   0x8   : > { %p736_p1 = scmp.eq.s32.totalorder %s392_s18, 0  ;;  %p140_p2 = scmp.lt.s32.totalorder %s676_s17, 3 }
   0x9   : > { %s151_s22 = sshll.u32 %s847_s1, 4  ;;  %s678_s24 = smov [#allocation5]   ;;  %s152_s22 = int_to_ptr.hbm [resolvable:$true] %s151_s22 }
   0xa   : > { %p744_p3 = pnand %p394_p0, %p140_p2  ;;  %s153_s25 = sshll.u32 %s678_s24, 4  ;;  %s154_s25 = int_to_ptr.vmem [resolvable:$true] %s153_s25 }
   0xb   : > { %p397_p6 = scmp.ge.s32.totalorder %s676_s17, 2  ;;  %s168_s28 = sshll.u32 %s848_s2, 4  ;;  %s169_s28 = int_to_ptr.hbm [resolvable:$true] %s168_s28 }
   0xc   : > { %p427_p4 = pneg %p744_p3  ;;  %s679_s29 = smov 64  }
   0xd   : > { %s680_s30 = smov 4   ;;  %s681_s4 = smov [#allocation7]  }
   0xe   : > { %p428_p5 = pnand %p427_p4, %p736_p1  ;;  %s170_s5 = sshll.u32 %s681_s4, 4  ;;  %s171_s5 = int_to_ptr.vmem [resolvable:$true] %s170_s5 }
   0xf   : > { %s29_s6 = sadd.s32 1, %s672_s16  ;;  %s393_s7 = sadd.s32 4294967294, %s676_s17  }
  0x10   : > { %430 = dma.hbm_to_vmem [thread:$0]  (!%p428_p5), %s152_s22, 128, %s154_s25, [#allocation6], %s679_s29, %s679_s29, %s680_s30  }
  0x11   : > { %433 = dma.hbm_to_vmem [thread:$0]  (!%p428_p5), %s169_s28, 128, %s171_s5, [#allocation6]  }
  0x12   : > { %p30_p7 = scmp.ge.s32.totalorder %s29_s6, 2  ;;  %s41_s8 = sadd.s32 1, %s664_s14 }
  0x13   : > { %p48_p8 = scmp.ne.s32.totalorder %s664_s14, %s660_s13  ;;  %p49_p9 = scmp.eq.s32.totalorder %s676_s17, 0 }
  0x14   : > { %s861_s6 = smov (%p30_p7, %s29_s6), 0  ;;  %p54_p10 = scmp.ne.s32.totalorder %s660_s13, %s656_s12 }
  0x15   : > { %s36_s9 = ssub.s32 %s672_s16, %s861_s6  ;;  %p127_p11 = scmp.eq.s32.totalorder %s392_s18, 1 }
  0x16   : > { %p39_p12 = scmp.eq.s32.totalorder %s36_s9, 0  ;;  %p772_p13 = por %p736_p1, %p54_p10 }
  0x17   : > { %p776_p0 = por %p127_p11, %p48_p8  ;;  %p133_p2 = scmp.eq.s32.totalorder %s393_s7, 1 }
  0x18   : > { %s781_s20 = scalar_select %p39_p12, %s664_s14, %s41_s8  }
  0x19   : > { %p50_p4 = por %p49_p9, %p48_p8  ;;  %p783_p5 = por %p133_p2, %p54_p10 }
  0x1a   : > { %s181_s22 = sand.u32 1, %s664_s14   ;;  %s399_s18 = sshll.u32 %s672_s16, 3 }
  0x1b   : > { %p444_p7 = scmp.lt.s32.totalorder %s676_s17, 2  ;;  %s398_s24 = sshll.u32 %s181_s22, 3 }
  0x1c   : > { %s190_s27 = scalar_lea.hbm %s846_s0, %s399_s18  ;;  %s185_s29 = scalar_lea.vmem [#allocation2], %s398_s24 }
  0x1d   : > { %s192_s28 = sshll.u32 %s190_s27, 4  ;;  %s194_s30 = sshll.u32 %s185_s29, 4  ;;  %s193_s28 = int_to_ptr.hbm [resolvable:$true] %s192_s28  ;;  %s195_s30 = int_to_ptr.vmem [resolvable:$true] %s194_s30 }
  0x1e   : > { %p435_p11 = pnand %p444_p7, %p50_p4  ;;  %s182_s4 = scalar_lea.sflag [#allocation3], %s181_s22 }
  0x1f   : > { %203 = sbr.rel (%p744_p3) target bundleno = 177 (0xb1), region = 32  ;;  %s796_s5 = sand.u32 (!%p744_p3), 1, %s660_s13  }
  0x20   : > { %437 = dma.hbm_to_vmem [thread:$0]  (!%p435_p11), %s193_s28, 128, %s195_s30, %s182_s4  }
  0x21   : > { %s401_s7 = sshll.u32 (!%p744_p3), %s796_s5, 3  ;;  %s206_s8 = scalar_lea.sflag (!%p744_p3), [#allocation3], %s796_s5 }
  0x22   : > { %s209_s9 = scalar_lea.vmem (!%p744_p3), [#allocation2], %s401_s7 }
  0x24   : > { %643 = dma.done.wait (%p772_p13), %s206_s8, 128  }
  0x25   : > { %645 = vsyncadd (%p772_p13), %s206_s8, 4294967168 }
  0x26   : > { %647 = dma.done.wait (%p736_p1), [#allocation6], 256  }
  0x27   : > { %649 = vsyncadd (%p736_p1), [#allocation6], 4294967040  ;;  %v414_v0 = vld [vmem:[#allocation5] sm:$0xff]  ;;  %v244_v1 = vld [vmem:[%s209_s9] sm:$0xff]  ;;  %vm255_vm0 = vcmask 130048   ;;  %s411_s23 = sshll.u32 %s668_s15, 3 }
  0x28   : > { %v245_v2 = vpack.c.bf16 %v244_v1, %v244_v1  ;;  %266 = vmatpush.bf16.msra.mxu0 %v414_v0  ;;  %s286_s10 = scalar_lea.hbm %s849_s3, %s411_s23  ;;  %v248_v3 = vld [vmem:[#allocation7] sm:$0xff]  ;;  %s242_s24 = scalar_lea.vmem [#allocation8], %s401_s7  ;;  %vm272_vm1 = vcmask 261120  }
  0x29   : > { %s288_s25 = sshll.u32 %s242_s24, 4  ;;  %s290_s26 = sshll.u32 %s286_s10, 4  ;;  %s289_s25 = int_to_ptr.vmem [resolvable:$true] %s288_s25  ;;  %s291_s26 = int_to_ptr.hbm [resolvable:$true] %s290_s26 }
  0x2a   : > { %s275_s19 = scalar_lea.sflag [#allocation4], %s796_s5  ;;  %s604_s27 = sshra.s32 %s291_s26, 4  ;;  %s605_s27 = int_to_ptr.hbm [resolvable:$true] %s604_s27 }
  0x2b   : > { %409 = vmatmul.msk.bf16.vlgmr.msra.gmra.mxu0 %vm255_vm0, %v245_v2  ;;  %s606_s28 = scalar_lea.hbm %s605_s27, 8  ;;  %s610_s30 = scalar_lea.hbm %s849_s3, 16 }
  0x2c   : > { %p607_p1 = scmp.ne.s32.totalorder %s605_s27, %s606_s28  ;;  %p611_p9 = scmp.lt.s32.totalorder %s605_s27, %s849_s3 }
  0x2d   : > { %p612_p10 = scmp.lt.s32.totalorder %s610_s30, %s606_s28 }
  0x2e   : > { %p608_p3 = pnand %p607_p1, %p776_p0 }
  0x2f   : > { %p613_p12 = por %p612_p10, %p611_p9 }
  0x30   : > { %p609_p8 = pneg %p608_p3 }
  0x32   : > { %p614_p13 = pnand %p613_p12, %p609_p8 }
  0xa8   : > { %v268_v4 = vpop.f32.mrf.mxu0 }
  0xa9   : > { %v269_v5 = vadd.f32 %v268_v4, %v248_v3 }
  0xab   : > { %273 = vst.msk [vmem:[%s242_s24] sm:$0xff] %vm272_vm1, %v269_v5 }
  0xac   : > { %617 = shalt.err (!%p614_p13)
}
  0xad   : > { %425 = dma.vmem_to_hbm [thread:$0]  (%p776_p0), %s289_s25, 128, %s291_s26, %s275_s19  }
  0xb0   : > { %v270_v6 = vpop.f32.mrf.mxu0 }
  0xb1 PF: > { %s302_s5 = sand.u32 1, %s656_s12   ;;  %p439_p2 = pnand %p397_p6, %p783_p5 }
  0xb2   : > { %s303_s8 = scalar_lea.sflag [#allocation4], %s302_s5 }
  0xb3   : > { %p440_p4 = pneg %p439_p2 }
  0xb5   : > { %651 = dma.done.wait (%p440_p4), %s303_s8, 128  }
  0xb6   : > { %653 = vsyncadd (%p440_p4), %s303_s8, 4294967168  ;;  %s20_s17 = sadd.s32 1, %s676_s17   ;;  %s855_s12 = smov %s660_s13 }
  0xb7   : > { %p17_p7 = scmp.ge.s32.totalorder %s20_s17, 4   ;;  %s856_s13 = smov %s664_s14 }
  0xb8   : > { %s857_s14 = smov %s781_s20  ;;  %s858_s15 = smov %s672_s16 }
  0xb9   : > { %s859_s16 = smov %s861_s6  ;;  %19 = sbr.rel (!%p17_p7) target bundleno = 7 (0x7), region = 86 }
  0xbe   :  { %309 = vsyncpa [#allocation3], 1 }
  0xbf   :  { %311 = vsyncpa [#allocation3 + $0x1], 1 }
  0xc0   :  { %312 = vsyncpa [#allocation6], 1 }
  0xc1   :  { %313 = vsyncpa [#allocation4], 1 }
  0xc2   :  { %315 = vsyncpa [#allocation4 + $0x1], 1 }

</bundles_post_ra>
